<compile_context>
chip_gen: v6e
topology: v6e:2x2x1
jax: 0.10.0
libtpu: 0.0.40
codegen_flags: <defaults>
</compile_context>

<pallas_src>
import functools

import jax
import jax.numpy as jnp
from jax.experimental import pallas as pl
from jax.experimental.pallas import tpu as pltpu


def se_kernel(x_ref, w1_ref, b1_ref, w2_ref, b2_ref, o_ref, *, inv_hw):
    # x_ref / o_ref block: (b_tile, C, HW_pad) — NCHW-native, HW on lanes.
    # w1_ref: (mid, C), b1_ref: (1, mid), w2_ref: (C, mid), b2_ref: (1, C).

    # Squeeze: batched lane-axis (XLU) sum over HW for the whole tile, scaled
    # by 1/true_HW (zero lane-padding is inert).  No MXU pass, no (HW,1)
    # constant eating vregs.
    pooled = jnp.sum(x_ref[...].astype(jnp.float32), axis=-1) * inv_hw  # (b, C)

    # Excitation: the two 1x1 convs as single batched NT matmuls with the
    # weights in their native PyTorch layout (contract the channel axis).
    h = jax.lax.dot_general(
        pooled, w1_ref[...], (((1,), (1,)), ((), ())),
        preferred_element_type=jnp.float32) + b1_ref[...]               # (b, mid)
    h = jnp.maximum(h, 0.0)
    s = jax.lax.dot_general(
        h, w2_ref[...], (((1,), (1,)), ((), ())),
        preferred_element_type=jnp.float32) + b2_ref[...]               # (b, C)
    s = jax.nn.sigmoid(s)

    # Scale: re-read x from VMEM (cheap) instead of holding the tile live
    # across the excitation; multiply in f32, cast only the product.
    o_ref[...] = (x_ref[...] * s[:, :, None]).astype(o_ref.dtype)


def se_block(x_nchw, w1, b1, w2, b2, *, b_tile=None):
    """x_nchw: (N, C, H, W); w1: (mid, C) [conv1 weight squeezed], b1: (mid,),
    w2: (C, mid) [conv2 weight squeezed], b2: (C,).  Returns (N, C, H, W)."""
    N, C, H, W = x_nchw.shape
    mid = w1.shape[0]
    HW = H * W

    # NCHW-native: this reshape is free (row-major contiguous) — no transpose
    # traffic outside the kernel.
    x_flat = x_nchw.reshape(N, C, HW)

    # Keep the lane axis a multiple of 128 so the writeback path is unmasked
    # vst for arbitrary H, W.  Zero padding is inert (see kernel).
    HW_pad = max(128, ((HW + 127) // 128) * 128)
    if HW_pad != HW:
        x_flat = jnp.pad(x_flat, ((0, 0), (0, 0), (0, HW_pad - HW)))

    b1_r = b1.reshape(1, mid)
    b2_r = b2.reshape(1, C)

    # ---- generation-aware tiling heuristics --------------------------------
    try:
        kind = jax.devices()[0].device_kind.lower()
    except Exception:
        kind = ""
    is_v7 = "v7" in kind
    num_cores = 2 if is_v7 else 1            # v5e/v6e: 1 TC; v7x: 2 TCs
    # x-block VMEM budget (in + out, double-buffered).  v5e/v6e: 128 MiB
    # physical VMEM -> be generous; v7x: 64 MiB physical (32 MiB scoped) ->
    # stay conservative so Mosaic keeps scratch headroom.
    x_budget = (12 << 20) if is_v7 else (48 << 20)
    vmem_limit = (32 << 20) if is_v7 else (64 << 20)

    if b_tile is None:
        bytes_per_batch = 2 * 2 * C * HW_pad * x_flat.dtype.itemsize
        b_tile = max(1, min(N, x_budget // max(bytes_per_batch, 1)))
        # Only split the batch axis for core parallelism on multi-TC parts;
        # on single-TC v5e/v6e splitting just doubles per-step overhead.
        if num_cores > 1 and N >= num_cores:
            b_tile = max(1, min(b_tile, N // num_cores))
    # Ragged tail: zero-pad N up to a multiple of b_tile (sliced off below)
    # instead of shrinking b_tile, which would explode grid-step overhead on
    # odd/prime batch sizes.
    N_pad = ((N + b_tile - 1) // b_tile) * b_tile
    if N_pad != N:
        x_flat = jnp.pad(x_flat, ((0, N_pad - N), (0, 0), (0, 0)))
    grid = N_pad // b_tile
    # TODO(synk): when a single batch element exceeds the VMEM budget
    # (very large C*HW), add a second 'arbitrary' grid axis over HW with a
    # pooled accumulator (pass 1) + gating pass (pass 2) instead of one
    # oversized block.

    kernel = functools.partial(se_kernel, inv_hw=1.0 / HW)

    out_flat = pl.pallas_call(
        kernel,
        out_shape=jax.ShapeDtypeStruct((N_pad, C, HW_pad), x_flat.dtype),
        grid_spec=pltpu.PrefetchScalarGridSpec(
            num_scalar_prefetch=0,
            grid=(grid,),
            in_specs=[
                pl.BlockSpec((b_tile, C, HW_pad), lambda n: (n, 0, 0)),
                pl.BlockSpec((mid, C), lambda n: (0, 0)),
                pl.BlockSpec((1, mid), lambda n: (0, 0)),
                pl.BlockSpec((C, mid), lambda n: (0, 0)),
                pl.BlockSpec((1, C), lambda n: (0, 0)),
            ],
            out_specs=pl.BlockSpec((b_tile, C, HW_pad), lambda n: (n, 0, 0)),
        ),
        compiler_params=pltpu.CompilerParams(
            dimension_semantics=("parallel",),
            vmem_limit_bytes=vmem_limit,
        ),
    )(x_flat, w1, b1_r, w2, b2_r)

    # Strip batch / lane padding (free slicing + contiguous reshape).
    return out_flat[:N, :, :HW].reshape(N, C, H, W)


def se_reference(x_nchw, w1, b1, w2, b2):
    """Plain-JAX reference matching the PyTorch forward (use_conv=True)."""
    pooled = jnp.mean(x_nchw, axis=(2, 3))                   # (N, C)
    h = jnp.maximum(pooled @ w1.T + b1, 0.0)                 # (N, mid)
    s = jax.nn.sigmoid(h @ w2.T + b2)                        # (N, C)
    return x_nchw * s[:, :, None, None]


if __name__ == "__main__":
    # Module config: channels=128, reduction=16 -> mid_channels=8, use_conv=True.
    N, C, H, W = 2, 128, 16, 16
    reduction = 16
    mid = C // reduction

    key = jax.random.PRNGKey(0)
    kx, k1, k2, k3, k4 = jax.random.split(key, 5)

    x = jax.random.normal(kx, (N, C, H, W), dtype=jnp.float32)
    # conv1: Conv2d(C, mid, 1) -> weight (mid, C, 1, 1) squeezed to (mid, C), bias (mid,)
    w1 = jax.random.normal(k1, (mid, C), dtype=jnp.float32) * 0.1
    b1 = jax.random.normal(k2, (mid,), dtype=jnp.float32) * 0.1
    # conv2: Conv2d(mid, C, 1) -> weight (C, mid, 1, 1) squeezed to (C, mid), bias (C,)
    w2 = jax.random.normal(k3, (C, mid), dtype=jnp.float32) * 0.1
    b2 = jax.random.normal(k4, (C,), dtype=jnp.float32) * 0.1

    out = se_block(x, w1, b1, w2, b2)
    out = jax.block_until_ready(out)

    ref = se_reference(x, w1, b1, w2, b2)
    assert out.shape == x.shape and out.dtype == x.dtype
    assert jnp.allclose(out, ref, atol=1e-4, rtol=1e-4), "mismatch vs reference"

    print("KERNEL_OK")
</pallas_src>

<mosaic_0001>
module attributes {stable_mosaic.version = 11 : i64} {
  func.func @se_kernel(%arg0: i32, %arg1: memref<2x128x256xf32, #tpu.memory_space<vmem>>, %arg2: memref<8x128xf32, #tpu.memory_space<vmem>>, %arg3: memref<1x8xf32, #tpu.memory_space<vmem>>, %arg4: memref<128x8xf32, #tpu.memory_space<vmem>>, %arg5: memref<1x128xf32, #tpu.memory_space<vmem>>, %arg6: memref<2x128x256xf32, #tpu.memory_space<vmem>>) attributes {dimension_semantics = [#tpu.dimension_semantics<parallel>], iteration_bounds = array<i64: 1>, scalar_prefetch = 0 : i64, scratch_operands = 0 : i64, tpu.core_type = #tpu.core_type<tc>, window_params = [{transform_indices = @transform_0, window_bounds = array<i64: 2, 128, 256>}, {pipeline_mode = #tpu.pipeline_mode<synchronous>, transform_indices = @transform_1, window_bounds = array<i64: 8, 128>}, {pipeline_mode = #tpu.pipeline_mode<synchronous>, transform_indices = @transform_2, window_bounds = array<i64: 1, 8>}, {pipeline_mode = #tpu.pipeline_mode<synchronous>, transform_indices = @transform_3, window_bounds = array<i64: 128, 8>}, {pipeline_mode = #tpu.pipeline_mode<synchronous>, transform_indices = @transform_4, window_bounds = array<i64: 1, 128>}, {transform_indices = @transform_5, window_bounds = array<i64: 2, 128, 256>}]} {
    %c0 = arith.constant 0 : index
    %c0_0 = arith.constant 0 : index
    %c0_1 = arith.constant 0 : index
    %0 = vector.load %arg1[%c0, %c0_0, %c0_1] : memref<2x128x256xf32, #tpu.memory_space<vmem>>, vector<2x128x256xf32>
    %cst = arith.constant dense<0.000000e+00> : vector<2x128xf32>
    %1 = vector.multi_reduction <add>, %0, %cst [2] : vector<2x128x256xf32> to vector<2x128xf32>
    %cst_2 = arith.constant 3.906250e-03 : f32
    %2 = vector.broadcast %cst_2 : f32 to vector<2x128xf32>
    %3 = arith.mulf %1, %2 : vector<2x128xf32>
    %c0_3 = arith.constant 0 : index
    %c0_4 = arith.constant 0 : index
    %4 = vector.load %arg2[%c0_3, %c0_4] : memref<8x128xf32, #tpu.memory_space<vmem>>, vector<8x128xf32>
    %cst_5 = arith.constant dense<0.000000e+00> : vector<2x8xf32>
    %5 = tpu.matmul %3, %4, %cst_5 {dimension_numbers = #tpu.dot_dimension_numbers<[1], [1], [0], [0], [0, 0, 1, 0], [], []>} : vector<2x128xf32>, vector<8x128xf32>, vector<2x8xf32> -> vector<2x8xf32>
    %c0_6 = arith.constant 0 : index
    %c0_7 = arith.constant 0 : index
    %6 = vector.load %arg3[%c0_6, %c0_7] : memref<1x8xf32, #tpu.memory_space<vmem>>, vector<1x8xf32>
    %7 = vector.broadcast %6 : vector<1x8xf32> to vector<2x8xf32>
    %8 = arith.addf %5, %7 : vector<2x8xf32>
    %cst_8 = arith.constant 0.000000e+00 : f32
    %9 = vector.broadcast %cst_8 : f32 to vector<2x8xf32>
    %10 = arith.maximumf %8, %9 : vector<2x8xf32>
    %c0_9 = arith.constant 0 : index
    %c0_10 = arith.constant 0 : index
    %11 = vector.load %arg4[%c0_9, %c0_10] : memref<128x8xf32, #tpu.memory_space<vmem>>, vector<128x8xf32>
    %cst_11 = arith.constant dense<0.000000e+00> : vector<2x128xf32>
    %12 = tpu.matmul %10, %11, %cst_11 {dimension_numbers = #tpu.dot_dimension_numbers<[1], [1], [0], [0], [0, 0, 1, 0], [], []>} : vector<2x8xf32>, vector<128x8xf32>, vector<2x128xf32> -> vector<2x128xf32>
    %c0_12 = arith.constant 0 : index
    %c0_13 = arith.constant 0 : index
    %13 = vector.load %arg5[%c0_12, %c0_13] : memref<1x128xf32, #tpu.memory_space<vmem>>, vector<1x128xf32>
    %14 = vector.broadcast %13 : vector<1x128xf32> to vector<2x128xf32>
    %15 = arith.addf %12, %14 : vector<2x128xf32>
    %16 = arith.negf %15 : vector<2x128xf32>
    %17 = math.exp %16 : vector<2x128xf32>
    %cst_14 = arith.constant 1.000000e+00 : f32
    %18 = vector.broadcast %cst_14 : f32 to vector<2x128xf32>
    %19 = arith.addf %18, %17 : vector<2x128xf32>
    %20 = arith.divf %18, %19 : vector<2x128xf32>
    %c0_15 = arith.constant 0 : index
    %c0_16 = arith.constant 0 : index
    %c0_17 = arith.constant 0 : index
    %21 = vector.load %arg1[%c0_15, %c0_16, %c0_17] : memref<2x128x256xf32, #tpu.memory_space<vmem>>, vector<2x128x256xf32>
    %22 = vector.shape_cast %20 : vector<2x128xf32> to vector<2x128x1xf32>
    %23 = vector.broadcast %22 : vector<2x128x1xf32> to vector<2x128x256xf32>
    %24 = arith.mulf %21, %23 : vector<2x128x256xf32>
    %c0_18 = arith.constant 0 : index
    %c0_19 = arith.constant 0 : index
    %c0_20 = arith.constant 0 : index
    %25 = vector.load %arg6[%c0_18, %c0_19, %c0_20] : memref<2x128x256xf32, #tpu.memory_space<vmem>>, vector<2x128x256xf32>
    tpu.vector_store %arg6[%c0_18, %c0_19, %c0_20], %24 {strides = array<i32>} : memref<2x128x256xf32, #tpu.memory_space<vmem>>, vector<2x128x256xf32>,
    return
  }
  func.func @transform_0(%arg0: i32) -> (i32, i32, i32) {
    %c0_i32 = arith.constant 0 : i32
    %c0_i32_0 = arith.constant 0 : i32
    %c0_i32_1 = arith.constant 0 : i32
    return %arg0, %c0_i32, %c0_i32_0 : i32, i32, i32
  }
  func.func @transform_1(%arg0: i32) -> (i32, i32) {
    %c0_i32 = arith.constant 0 : i32
    %c0_i32_0 = arith.constant 0 : i32
    %c0_i32_1 = arith.constant 0 : i32
    return %c0_i32, %c0_i32_0 : i32, i32
  }
  func.func @transform_2(%arg0: i32) -> (i32, i32) {
    %c0_i32 = arith.constant 0 : i32
    %c0_i32_0 = arith.constant 0 : i32
    %c0_i32_1 = arith.constant 0 : i32
    return %c0_i32, %c0_i32_0 : i32, i32
  }
  func.func @transform_3(%arg0: i32) -> (i32, i32) {
    %c0_i32 = arith.constant 0 : i32
    %c0_i32_0 = arith.constant 0 : i32
    %c0_i32_1 = arith.constant 0 : i32
    return %c0_i32, %c0_i32_0 : i32, i32
  }
  func.func @transform_4(%arg0: i32) -> (i32, i32) {
    %c0_i32 = arith.constant 0 : i32
    %c0_i32_0 = arith.constant 0 : i32
    %c0_i32_1 = arith.constant 0 : i32
    return %c0_i32, %c0_i32_0 : i32, i32
  }
  func.func @transform_5(%arg0: i32) -> (i32, i32, i32) {
    %c0_i32 = arith.constant 0 : i32
    %c0_i32_0 = arith.constant 0 : i32
    %c0_i32_1 = arith.constant 0 : i32
    return %arg0, %c0_i32, %c0_i32_0 : i32, i32, i32
  }
}

</mosaic_0001>

<bundles_post_ra>
// kernel: tpu_custom_call.1
= control target key start
LH: loop header
LB: loop body
LE: loop exit
PB: predicated region body
PF: predicated region fallthrough
CT: control target
= control target key end

     0   :  { %10 = vsyncpa [#allocation3], 0  ;;  %s1607_s0 = inlined_call_operand.hbm [shape: f32[2,128,256], index: 0, kind: input, shape index: {}]   ;;  %s1608_s1 = inlined_call_operand.vmem [shape: f32[8,128], index: 1, kind: input, shape index: {}]   ;;  %s1609_s2 = inlined_call_operand.vmem [shape: f32[1,8], index: 2, kind: input, shape index: {}]   ;;  %s1610_s3 = inlined_call_operand.vmem [shape: f32[128,8], index: 3, kind: input, shape index: {}]   ;;  %s1611_s4 = inlined_call_operand.vmem [shape: f32[1,128], index: 4, kind: input, shape index: {}]   ;;  %s1612_s5 = inlined_call_operand.hbm [shape: f32[2,128,256], index: 5, kind: output, shape index: {}]  }
   0x1   :  { %11 = vsyncpa [#allocation4], 0  ;;  %s1094_s18 = smov [#allocation2]  }
   0x2   :  { %s17_s19 = sshll.u32 %s1094_s18, 4  ;;  %s18_s19 = int_to_ptr.vmem [resolvable:$true] %s17_s19 }
   0x3   :  { %s1058_s20 = scalar_lea.vmem %s18_s19, 8192  ;;  %p1063_p1 = scmp.lt.s32.totalorder %s18_s19, %s18_s19 }
   0x4   :  { %p1059_p0 = scmp.ne.s32.totalorder %s18_s19, %s1058_s20  ;;  %p1064_p2 = scmp.lt.s32.totalorder %s1058_s20, %s1058_s20 }
   0x6   :  { %p1065_p3 = por %p1064_p2, %p1063_p1 }
   0x8   :  { %p1066_p4 = pnand %p1065_p3, %p1059_p0 }
   0xa   :  { %1069 = shalt.err (!%p1066_p4)
}
   0xb   :  { %s1095_s21 = smov 256   ;;  %s1096_s22 = smov 16  }
   0xc   :  { %23 = dma.hbm_to_vmem [thread:$0]  %s1607_s0, 8192, %s18_s19, [#allocation3], %s1095_s21, %s1095_s21, %s1096_s22  }
   0xd   :  { %1090 = dma.done.wait [#allocation3], 8192  }
   0xe   :  { %1091 = vsyncadd [#allocation3], 4294959104  ;;  %v1136_v0 = vld [vmem:[#allocation2 + $0x100] sm:$0xff]  ;;  %v1138_v1 = vld [vmem:[#allocation2 + $0x108] sm:$0xff]  ;;  %vm1098_vm0 = vmmov 0   ;;  %vm554_vm1 = vcmask 64512  }
   0xf   :  { %1665 = vst [vmem:[#allocation8_spill] sm:$0xff] %v1136_v0  ;;  %1666 = vst [vmem:[#allocation9_spill] sm:$0xff] %v1138_v1  ;;  %v1140_v2 = vld [vmem:[#allocation2] sm:$0xff]  ;;  %v147_v3 = vadd.f32 %v1138_v1, %v1136_v0  ;;  %v1144_v4 = vld [vmem:[#allocation2 + $0x8] sm:$0xff]  ;;  %vm278_vm2 = vcmask 130112   ;;  %vm285_vm3 = vcmask 195712  }
  0x10   :  { %v1146_v5 = vld [vmem:[#allocation2 + $0x110] sm:$0xff]  ;;  %v1148_v6 = vld [vmem:[#allocation2 + $0x118] sm:$0xff]  ;;  %v99_v7 = vadd.f32 %v1144_v4, %v1140_v2  ;;  %v1160_v12 = vld [vmem:[#allocation2 + $0x120] sm:$0xff]  ;;  %vm292_vm4 = vcmask 261312   ;;  %vm299_vm5 = vcmask 326912   ;;  %vm306_vm6 = vcmask 392512  }
  0x11   :  { %1667 = vst [vmem:[#allocation10_spill] sm:$0xff] %v1146_v5  ;;  %1668 = vst [vmem:[#allocation11_spill] sm:$0xff] %v1148_v6  ;;  %v1152_v8 = vld [vmem:[#allocation2 + $0x10] sm:$0xff]  ;;  %v1154_v9 = vld [vmem:[#allocation2 + $0x18] sm:$0xff]  ;;  %148 = vadd.xlane.f32.xlu1 %v147_v3  ;;  %v150_v10 = vadd.f32 %v1148_v6, %v1146_v5  ;;  %vm313_vm7 = vcmask 458112   ;;  %vm320_vm8 = vcmask 523712  }
  0x12   :  { %100 = vadd.xlane.f32.xlu0 %v99_v7  ;;  %v102_v11 = vadd.f32 %v1154_v9, %v1152_v8  ;;  %1669 = vst [vmem:[#allocation12_spill] sm:$0xff] %v1160_v12  ;;  %v1162_v13 = vld [vmem:[#allocation2 + $0x128] sm:$0xff]  ;;  %v1164_v14 = vld [vmem:[#allocation2 + $0x20] sm:$0xff]  ;;  %v1172_v18 = vld [vmem:[#allocation2 + $0x130] sm:$0xff]  ;;  %vm327_vm9 = vcmask 589312   ;;  %vm334_vm10 = vcmask 654912  }
  0x13   :  { %1670 = vst [vmem:[#allocation13_spill] sm:$0xff] %v1162_v13  ;;  %v1166_v15 = vld [vmem:[#allocation2 + $0x28] sm:$0xff]  ;;  %v153_v16 = vadd.f32 %v1162_v13, %v1160_v12  ;;  %1671 = vst [vmem:[#allocation14_spill] sm:$0xff] %v1172_v18  ;;  %v1174_v19 = vld [vmem:[#allocation2 + $0x138] sm:$0xff]  ;;  %vm341_vm11 = vcmask 720512   ;;  %vm348_vm12 = vcmask 786112  }
  0x14   :  { %v105_v17 = vadd.f32 %v1166_v15, %v1164_v14  ;;  %1672 = vst [vmem:[#allocation15_spill] sm:$0xff] %v1174_v19  ;;  %v1176_v20 = vld [vmem:[#allocation2 + $0x30] sm:$0xff]  ;;  %v1178_v21 = vld [vmem:[#allocation2 + $0x38] sm:$0xff]  ;;  %v156_v22 = vadd.f32 %v1174_v19, %v1172_v18  ;;  %v1184_v24 = vld [vmem:[#allocation2 + $0x140] sm:$0xff]  ;;  %vm355_vm13 = vcmask 851712   ;;  %vm362_vm14 = vcmask 917312  }
  0x15   :  { %151 = vadd.xlane.f32.xlu1 %v150_v10  ;;  %v108_v23 = vadd.f32 %v1178_v21, %v1176_v20  ;;  %1673 = vst [vmem:[#allocation16_spill] sm:$0xff] %v1184_v24  ;;  %v1186_v25 = vld [vmem:[#allocation2 + $0x148] sm:$0xff]  ;;  %v1188_v26 = vld [vmem:[#allocation2 + $0x40] sm:$0xff]  ;;  %v1196_v30 = vld [vmem:[#allocation2 + $0x150] sm:$0xff]  ;;  %vm369_vm15 = vcmask 982912  }
  0x16   :  { %103 = vadd.xlane.f32.xlu0 %v102_v11  ;;  %1674 = vst [vmem:[#allocation17_spill] sm:$0xff] %v1186_v25  ;;  %v1190_v27 = vld [vmem:[#allocation2 + $0x48] sm:$0xff]  ;;  %v159_v28 = vadd.f32 %v1186_v25, %v1184_v24  ;;  %1675 = vst [vmem:[#allocation18_spill] sm:$0xff] %v1196_v30  ;;  %v1198_v31 = vld [vmem:[#allocation2 + $0x158] sm:$0xff] }
  0x17   :  { %v111_v29 = vadd.f32 %v1190_v27, %v1188_v26  ;;  %1676 = vst [vmem:[#allocation19_spill] sm:$0xff] %v1198_v31  ;;  %v1200_v32 = vld [vmem:[#allocation2 + $0x50] sm:$0xff]  ;;  %v1202_v33 = vld [vmem:[#allocation2 + $0x58] sm:$0xff]  ;;  %v162_v34 = vadd.f32 %v1198_v31, %v1196_v30  ;;  %v1208_v36 = vld [vmem:[#allocation2 + $0x160] sm:$0xff] }
  0x18   :  { %1677 = vst [vmem:[#allocation20_spill] sm:$0xff] %v1200_v32  ;;  %1678 = vst [vmem:[#allocation21_spill] sm:$0xff] %v1202_v33  ;;  %v114_v35 = vadd.f32 %v1202_v33, %v1200_v32  ;;  %v1210_v37 = vld [vmem:[#allocation2 + $0x168] sm:$0xff]  ;;  %v1212_v38 = vld [vmem:[#allocation2 + $0x60] sm:$0xff] }
  0x19   :  { %154 = vadd.xlane.f32.xlu1 %v153_v16  ;;  %1679 = vst [vmem:[#allocation22_spill] sm:$0xff] %v1208_v36  ;;  %1680 = vst [vmem:[#allocation23_spill] sm:$0xff] %v1210_v37  ;;  %v1214_v39 = vld [vmem:[#allocation2 + $0x68] sm:$0xff]  ;;  %v165_v40 = vadd.f32 %v1210_v37, %v1208_v36  ;;  %v1220_v42 = vld [vmem:[#allocation2 + $0x170] sm:$0xff] }
  0x1a   :  { %106 = vadd.xlane.f32.xlu0 %v105_v17  ;;  %v117_v41 = vadd.f32 %v1214_v39, %v1212_v38  ;;  %1681 = vst [vmem:[#allocation24_spill] sm:$0xff] %v1220_v42  ;;  %v1222_v43 = vld [vmem:[#allocation2 + $0x178] sm:$0xff]  ;;  %v1224_v44 = vld [vmem:[#allocation2 + $0x70] sm:$0xff]  ;;  %v1232_v48 = vld [vmem:[#allocation2 + $0x180] sm:$0xff] }
  0x1b   :  { %1682 = vst [vmem:[#allocation25_spill] sm:$0xff] %v1222_v43  ;;  %1683 = vst [vmem:[#allocation26_spill] sm:$0xff] %v1224_v44  ;;  %v1226_v45 = vld [vmem:[#allocation2 + $0x78] sm:$0xff]  ;;  %v168_v46 = vadd.f32 %v1222_v43, %v1220_v42  ;;  %v1234_v49 = vld [vmem:[#allocation2 + $0x188] sm:$0xff] }
  0x1c   :  { %1684 = vst [vmem:[#allocation27_spill] sm:$0xff] %v1226_v45  ;;  %v120_v47 = vadd.f32 %v1226_v45, %v1224_v44  ;;  %1685 = vst [vmem:[#allocation28_spill] sm:$0xff] %v1232_v48  ;;  %v1236_v50 = vld [vmem:[#allocation2 + $0x80] sm:$0xff]  ;;  %v1238_v51 = vld [vmem:[#allocation2 + $0x88] sm:$0xff]  ;;  %v171_v52 = vadd.f32 %v1234_v49, %v1232_v48 }
  0x1d   :  { %157 = vadd.xlane.f32.xlu1 %v156_v22  ;;  %1686 = vst [vmem:[#allocation29_spill] sm:$0xff] %v1234_v49  ;;  %1687 = vst [vmem:[#allocation30_spill] sm:$0xff] %v1236_v50  ;;  %v123_v53 = vadd.f32 %v1238_v51, %v1236_v50  ;;  %v1244_v54 = vld [vmem:[#allocation2 + $0x190] sm:$0xff]  ;;  %v1246_v55 = vld [vmem:[#allocation2 + $0x198] sm:$0xff]  ;;  %v267_v49 = vlaneseq }
  0x1e   :  { %109 = vadd.xlane.f32.xlu0 %v108_v23  ;;  %1688 = vst [vmem:[#allocation31_spill] sm:$0xff] %v1238_v51  ;;  %1689 = vst [vmem:[#allocation32_spill] sm:$0xff] %v1244_v54  ;;  %v1248_v56 = vld [vmem:[#allocation2 + $0x90] sm:$0xff]  ;;  %v1250_v57 = vld [vmem:[#allocation2 + $0x98] sm:$0xff]  ;;  %v174_v58 = vadd.f32 %v1246_v55, %v1244_v54 }
  0x1f   :  { %1690 = vst [vmem:[#allocation33_spill] sm:$0xff] %v1246_v55  ;;  %1691 = vst [vmem:[#allocation34_spill] sm:$0xff] %v1248_v56  ;;  %v126_v59 = vadd.f32 %v1250_v57, %v1248_v56  ;;  %v1256_v60 = vld [vmem:[#allocation2 + $0x1a0] sm:$0xff]  ;;  %v1258_v61 = vld [vmem:[#allocation2 + $0x1a8] sm:$0xff]  ;;  %v268_v48 = vand.u32 127, %v267_v49  ;;  %v1401_v31 = vshrl.u32 %v267_v49, 7 }
  0x20   :  { %1692 = vst [vmem:[#allocation35_spill] sm:$0xff] %v1250_v57  ;;  %1693 = vst [vmem:[#allocation36_spill] sm:$0xff] %v1256_v60  ;;  %v1260_v62 = vld [vmem:[#allocation2 + $0xa0] sm:$0xff]  ;;  %v1262_v63 = vld [vmem:[#allocation2 + $0xa8] sm:$0xff]  ;;  %v177_v3 = vadd.f32 %v1258_v61, %v1256_v60 }
  0x21   :  { %160 = vadd.xlane.f32.xlu1 %v159_v28  ;;  %1694 = vst [vmem:[#allocation37_spill] sm:$0xff] %v1258_v61  ;;  %1695 = vst [vmem:[#allocation38_spill] sm:$0xff] %v1260_v62  ;;  %v129_v7 = vadd.f32 %v1262_v63, %v1260_v62  ;;  %v1268_v10 = vld [vmem:[#allocation2 + $0x1b0] sm:$0xff]  ;;  %v1270_v11 = vld [vmem:[#allocation2 + $0x1b8] sm:$0xff]  ;;  %v273_v30 = vadd.s32 4294967288, %v268_v48  ;;  %v280_v37 = vadd.s32 4294967280, %v268_v48  ;;  %v1408_v13 = vsub.s32 %v268_v48, %v1401_v31 }
  0x22   :  { %112 = vadd.xlane.f32.xlu0 %v111_v29  ;;  %1696 = vst [vmem:[#allocation39_spill] sm:$0xff] %v1262_v63  ;;  %1697 = vst [vmem:[#allocation40_spill] sm:$0xff] %v1268_v10  ;;  %v1272_v16 = vld [vmem:[#allocation2 + $0xb0] sm:$0xff]  ;;  %v1274_v17 = vld [vmem:[#allocation2 + $0xb8] sm:$0xff]  ;;  %v180_v22 = vadd.f32 %v1270_v11, %v1268_v10  ;;  %v287_v19 = vadd.s32 4294967272, %v268_v48  ;;  %v294_v18 = vadd.s32 4294967264, %v268_v48 }
  0x23   :  { %1698 = vst [vmem:[#allocation41_spill] sm:$0xff] %v1270_v11  ;;  %1699 = vst [vmem:[#allocation42_spill] sm:$0xff] %v1272_v16  ;;  %v132_v23 = vadd.f32 %v1274_v17, %v1272_v16  ;;  %v1280_v28 = vld [vmem:[#allocation2 + $0x1c0] sm:$0xff]  ;;  %v1282_v29 = vld [vmem:[#allocation2 + $0x1c8] sm:$0xff]  ;;  %v301_v24 = vadd.s32 4294967256, %v268_v48  ;;  %v308_v6 = vadd.s32 4294967248, %v268_v48  ;;  %v276_v49 = vsub.s32 %v273_v30, %v1401_v31 }
  0x24   :  { %1700 = vst [vmem:[#allocation43_spill] sm:$0xff] %v1274_v17  ;;  %1701 = vst [vmem:[#allocation44_spill] sm:$0xff] %v1280_v28  ;;  %v1322_v10 = vld [vmem:[#allocation2 + $0xf8] sm:$0xff]  ;;  %v315_v5 = vadd.s32 4294967240, %v268_v48  ;;  %v322_v12 = vadd.s32 4294967232, %v268_v48  ;;  %v1412_v1 = vsub.s32 %v280_v37, %v1401_v31  ;;  %v350_v17 = vadd.s32 4294967200, %v268_v48 }
  0x25   :  { %163 = vadd.xlane.f32.xlu1 %v162_v34  ;;  %1702 = vst [vmem:[#allocation45_spill] sm:$0xff] %v1282_v29  ;;  %v1284_v34 = vld [vmem:[#allocation2 + $0xc0] sm:$0xff]  ;;  %1716 = vst [vmem:[#allocation59_spill] sm:$0xff] %v1322_v10  ;;  %v1425_v30 = vsub.s32 %v301_v24, %v1401_v31  ;;  %v1428_v37 = vsub.s32 %v308_v6, %v1401_v31 }
  0x26   :  { %115 = vadd.xlane.f32.xlu0 %v114_v35  ;;  %1703 = vst [vmem:[#allocation46_spill] sm:$0xff] %v1284_v34  ;;  %v1286_v35 = vld [vmem:[#allocation2 + $0xc8] sm:$0xff]  ;;  %v1431_v16 = vsub.s32 %v315_v5, %v1401_v31  ;;  %v364_v5 = vadd.s32 4294967184, %v268_v48 }
  0x27   :  { %1704 = vst [vmem:[#allocation47_spill] sm:$0xff] %v1286_v35 }
  0x29   :  { %166 = vadd.xlane.f32.xlu1 %v165_v40  ;;  %v183_v40 = vadd.f32 %v1282_v29, %v1280_v28 }
  0x2a   :  { %118 = vadd.xlane.f32.xlu0 %v117_v41  ;;  %v135_v41 = vadd.f32 %v1286_v35, %v1284_v34  ;;  %v357_v35 = vadd.s32 4294967192, %v268_v48 }
  0x2d   :  { %169 = vadd.xlane.f32.xlu1 %v168_v46  ;;  %v1292_v46 = vld [vmem:[#allocation2 + $0x1d0] sm:$0xff] }
  0x2e   :  { %121 = vadd.xlane.f32.xlu0 %v120_v47  ;;  %1705 = vst [vmem:[#allocation48_spill] sm:$0xff] %v1292_v46  ;;  %v1294_v47 = vld [vmem:[#allocation2 + $0x1d8] sm:$0xff] }
  0x2f   :  { %1706 = vst [vmem:[#allocation49_spill] sm:$0xff] %v1294_v47 }
  0x31   :  { %172 = vadd.xlane.f32.xlu1 %v171_v52  ;;  %v1296_v52 = vld [vmem:[#allocation2 + $0xd0] sm:$0xff] }
  0x32   :  { %124 = vadd.xlane.f32.xlu0 %v123_v53  ;;  %1707 = vst [vmem:[#allocation50_spill] sm:$0xff] %v1296_v52  ;;  %v1298_v53 = vld [vmem:[#allocation2 + $0xd8] sm:$0xff] }
  0x33   :  { %1708 = vst [vmem:[#allocation51_spill] sm:$0xff] %v1298_v53 }
  0x35   :  { %175 = vadd.xlane.f32.xlu1 %v174_v58  ;;  %v186_v58 = vadd.f32 %v1294_v47, %v1292_v46  ;;  %v1318_v47 = vld [vmem:[#allocation2 + $0x1f8] sm:$0xff]  ;;  %v1320_v46 = vld [vmem:[#allocation2 + $0xf0] sm:$0xff] }
  0x36   :  { %127 = vadd.xlane.f32.xlu0 %v126_v59  ;;  %v138_v59 = vadd.f32 %v1298_v53, %v1296_v52  ;;  %1714 = vst [vmem:[#allocation57_spill] sm:$0xff] %v1318_v47  ;;  %1715 = vst [vmem:[#allocation58_spill] sm:$0xff] %v1320_v46  ;;  %v343_v53 = vadd.s32 4294967208, %v268_v48  ;;  %v1417_v52 = vsub.s32 %v287_v19, %v1401_v31 }
  0x37   :  { %v1434_v19 = vsub.s32 %v322_v12, %v1401_v31  ;;  %v1446_v12 = vsub.s32 %v350_v17, %v1401_v31  ;;  %v1454_v17 = vsub.s32 %v364_v5, %v1401_v31 }
  0x38   :  { %v1443_v63 = vsub.s32 %v343_v53, %v1401_v31  ;;  %v371_v53 = vadd.s32 4294967176, %v268_v48 }
  0x39   :  { %178 = vadd.xlane.f32.xlu1 %v177_v3  ;;  %v1304_v3 = vld [vmem:[#allocation2 + $0x1e0] sm:$0xff] }
  0x3a   :  { %130 = vadd.xlane.f32.xlu0 %v129_v7  ;;  %1709 = vst [vmem:[#allocation52_spill] sm:$0xff] %v1304_v3  ;;  %v1306_v7 = vld [vmem:[#allocation2 + $0x1e8] sm:$0xff] }
  0x3b   :  { %1710 = vst [vmem:[#allocation53_spill] sm:$0xff] %v1306_v7  ;;  %v189_v11 = vadd.f32 %v1306_v7, %v1304_v3  ;;  %v227_v7 = vld [vmem:[%s1608_s1] sm:$0xff] }
  0x3d   :  { %181 = vadd.xlane.f32.xlu1 %v180_v22  ;;  %v1308_v22 = vld [vmem:[#allocation2 + $0xe0] sm:$0xff] }
  0x3e   :  { %133 = vadd.xlane.f32.xlu0 %v132_v23  ;;  %1711 = vst [vmem:[#allocation54_spill] sm:$0xff] %v1308_v22  ;;  %v1310_v23 = vld [vmem:[#allocation2 + $0xe8] sm:$0xff] }
  0x3f   :  { %1712 = vst [vmem:[#allocation55_spill] sm:$0xff] %v1310_v23 }
  0x41   :  { %184 = vadd.xlane.f32.xlu1 %v183_v40  ;;  %v141_v40 = vadd.f32 %v1310_v23, %v1308_v22  ;;  %v1420_v23 = vsub.s32 %v294_v18, %v1401_v31 }
  0x42   :  { %136 = vadd.xlane.f32.xlu0 %v135_v41  ;;  %v1316_v41 = vld [vmem:[#allocation2 + $0x1f0] sm:$0xff] }
  0x43   :  { %1713 = vst [vmem:[#allocation56_spill] sm:$0xff] %v1316_v41  ;;  %v192_v29 = vadd.f32 %v1318_v47, %v1316_v41 }
  0x45   :  { %187 = vadd.xlane.f32.xlu1 %v186_v58  ;;  %v144_v58 = vadd.f32 %v1322_v10, %v1320_v46  ;;  %v329_v10 = vadd.s32 4294967224, %v268_v48  ;;  %v336_v46 = vadd.s32 4294967216, %v268_v48 }
  0x46   :  { %139 = vadd.xlane.f32.xlu0 %v138_v59  ;;  %v1097_v59 = vmov 0.0  }
  0x47   :  { %1000 = vmatprep.subr.mxu0 %v1097_v59  ;;  %1005 = vmatprep.subr.mxu1 %v1097_v59  ;;  %v1437_v18 = vsub.s32 %v329_v10, %v1401_v31  ;;  %v1440_v57 = vsub.s32 %v336_v46, %v1401_v31  ;;  %v1449_v46 = vsub.s32 %v357_v35, %v1401_v31 }
  0x48   :  { %1001 = vmatpush3.xpose.msra.mxu0 %v227_v7  ;;  %1002 = vmatprep.mubr.msk.f32.mxu0 %vm1098_vm0, %v1097_v59  ;;  %v544_v7 = vld [vmem:[%s1610_s3 + $0x68] sm:$0xff] }
  0x49   :  { %190 = vadd.xlane.f32.xlu1 %v189_v11  ;;  %1037 = vmatprep.mubr.msk.f32.mxu1 %vm1098_vm0, %v1097_v59  ;;  %v546_v11 = vld [vmem:[%s1610_s3 + $0x78] sm:$0xff]  ;;  %vm376_vm0 = vcmask 1048512  }
  0x4a   :  { %142 = vadd.xlane.f32.xlu0 %v141_v40  ;;  %1006 = vmatpush3.xpose.msk.msra.mxu1 %vm554_vm1, %v546_v11  ;;  %v543_v40 = vld [vmem:[%s1610_s3 + $0x60] sm:$0xff]  ;;  %v541_v11 = vld [vmem:[%s1610_s3 + $0x50] sm:$0xff] }
  0x4b   :  { %1007 = vmatprep.subr.mxu1 %v1097_v59 }
  0x4d   :  { %193 = vadd.xlane.f32.xlu1 %v192_v29  ;;  %v545_v29 = vld [vmem:[%s1610_s3 + $0x70] sm:$0xff] }
  0x4e   :  { %145 = vadd.xlane.f32.xlu0 %v144_v58  ;;  %1008 = vmatpush3.xpose.msk.msra.mxu1 %vm554_vm1, %v545_v29  ;;  %v542_v58 = vld [vmem:[%s1610_s3 + $0x58] sm:$0xff]  ;;  %v540_v29 = vld [vmem:[%s1610_s3 + $0x48] sm:$0xff] }
  0x4f   :  { %1009 = vmatprep.subr.mxu1 %v1097_v59 }
  0x52   :  { %1010 = vmatpush3.xpose.msk.msra.mxu1 %vm554_vm1, %v544_v7  ;;  %v539_v7 = vld [vmem:[%s1610_s3 + $0x40] sm:$0xff] }
  0x53   :  { %1011 = vmatprep.subr.mxu1 %v1097_v59 }
  0x56   :  { %1012 = vmatpush3.xpose.msk.msra.mxu1 %vm554_vm1, %v543_v40  ;;  %v538_v40 = vld [vmem:[%s1610_s3 + $0x38] sm:$0xff] }
  0x57   :  { %1013 = vmatprep.subr.mxu1 %v1097_v59 }
  0x5a   :  { %1014 = vmatpush3.xpose.msk.msra.mxu1 %vm554_vm1, %v542_v58  ;;  %v537_v58 = vld [vmem:[%s1610_s3 + $0x30] sm:$0xff] }
  0x5b   :  { %1015 = vmatprep.subr.mxu1 %v1097_v59 }
  0x5e   :  { %1016 = vmatpush3.xpose.msk.msra.mxu1 %vm554_vm1, %v541_v11  ;;  %v536_v11 = vld [vmem:[%s1610_s3 + $0x28] sm:$0xff] }
  0x5f   :  { %1017 = vmatprep.subr.mxu1 %v1097_v59 }
  0x62   :  { %1018 = vmatpush3.xpose.msk.msra.mxu1 %vm554_vm1, %v540_v29  ;;  %v535_v29 = vld [vmem:[%s1610_s3 + $0x20] sm:$0xff] }
  0x63   :  { %1019 = vmatprep.subr.mxu1 %v1097_v59 }
  0x66   :  { %1020 = vmatpush3.xpose.msk.msra.mxu1 %vm554_vm1, %v539_v7  ;;  %v534_v7 = vld [vmem:[%s1610_s3 + $0x18] sm:$0xff] }
  0x67   :  { %1021 = vmatprep.subr.mxu1 %v1097_v59 }
  0x6a   :  { %1022 = vmatpush3.xpose.msk.msra.mxu1 %vm554_vm1, %v538_v40  ;;  %v533_v40 = vld [vmem:[%s1610_s3 + $0x10] sm:$0xff] }
  0x6b   :  { %1023 = vmatprep.subr.mxu1 %v1097_v59 }
  0x6e   :  { %1024 = vmatpush3.xpose.msk.msra.mxu1 %vm554_vm1, %v537_v58  ;;  %v532_v58 = vld [vmem:[%s1610_s3 + $0x8] sm:$0xff] }
  0x6f   :  { %1025 = vmatprep.subr.mxu1 %v1097_v59 }
  0x72   :  { %1026 = vmatpush3.xpose.msk.msra.mxu1 %vm554_vm1, %v536_v11 }
  0x73   :  { %1027 = vmatprep.subr.mxu1 %v1097_v59 }
  0x76   :  { %1028 = vmatpush3.xpose.msk.msra.mxu1 %vm554_vm1, %v535_v29 }
  0x77   :  { %1029 = vmatprep.subr.mxu1 %v1097_v59 }
  0x7a   :  { %1030 = vmatpush3.xpose.msk.msra.mxu1 %vm554_vm1, %v534_v7 }
  0x7b   :  { %1031 = vmatprep.subr.mxu1 %v1097_v59 }
  0x7e   :  { %1032 = vmatpush3.xpose.msk.msra.mxu1 %vm554_vm1, %v533_v40 }
  0x7f   :  { %1033 = vmatprep.subr.mxu1 %v1097_v59 }
  0x82   :  { %1034 = vmatpush3.xpose.msk.msra.mxu1 %vm554_vm1, %v532_v58 }
  0x83   :  { %1035 = vmatprep.subr.mxu1 %v1097_v59 }
  0x9a   :  { %v149_v11 = vpop.xlane.xlu1 %148 }
  0x9b   :  { %v101_v29 = vpop.xlane.xlu0 %100  ;;  %v211_v62 = vmul.f32 0.00390625, %v149_v11 }
  0x9c   :  { %v195_v10 = vmul.f32 0.00390625, %v101_v29 }
  0x9e   :  { %v152_v47 = vpop.xlane.xlu1 %151  ;;  %v272_v48 = vrot.slane %v195_v10, %v1408_v13 }
  0x9f   :  { %v104_v41 = vpop.xlane.xlu0 %103  ;;  %v212_v34 = vmul.f32 0.00390625, %v152_v47 }
  0xa0   :  { %v196_v24 = vmul.f32 0.00390625, %v104_v41 }
  0xa1   :  { %v385_v41 = vrot.slane %v212_v34, %v276_v49 }
  0xa2   :  { %v155_v7 = vpop.xlane.xlu1 %154  ;;  %v277_v32 = vrot.slane %v196_v24, %v276_v49 }
  0xa3   :  { %v107_v3 = vpop.xlane.xlu0 %106  ;;  %v213_v56 = vmul.f32 0.00390625, %v155_v7 }
  0xa4   :  { %v197_v47 = vmul.f32 0.00390625, %v107_v3 }
  0xa5   :  { %v390_v11 = vrot.slane %v213_v56, %v1412_v1 }
  0xa6   :  { %v158_v28 = vpop.xlane.xlu1 %157 }
  0xa7   :  { %v110_v55 = vpop.xlane.xlu0 %109  ;;  %v214_v45 = vmul.f32 0.00390625, %v158_v28 }
  0xa8   :  { %v198_v51 = vmul.f32 0.00390625, %v110_v55  ;;  %v381_v55 = vrot.slane %v211_v62, %v1408_v13 }
  0xa9   :  { %v395_v35 = vrot.slane %v214_v45, %v1417_v52  ;;  %v1468_v45 = vsub.s32 %v371_v53, %v1401_v31 }
  0xaa   :  { %v161_v54 = vpop.xlane.xlu1 %160  ;;  %v291_v56 = vrot.slane %v198_v51, %v1417_v52 }
  0xab   :  { %v113_v61 = vpop.xlane.xlu0 %112  ;;  %v215_v50 = vmul.f32 0.00390625, %v161_v54  ;;  %v284_v54 = vrot.slane %v197_v47, %v1412_v1 }
  0xac   :  { %v199_v7 = vmul.f32 0.00390625, %v113_v61 }
  0xad   :  { %v400_v61 = vrot.slane %v215_v50, %v1420_v23 }
  0xae   :  { %v164_v60 = vpop.xlane.xlu1 %163  ;;  %v298_v62 = vrot.slane %v199_v7, %v1420_v23 }
  0xaf   :  { %v1391_v40 = vpop.xlane.xlu0 %115  ;;  %v216_v33 = vmul.f32 0.00390625, %v164_v60 }
  0xb0   :  { %v200_v28 = vmul.f32 0.00390625, %v1391_v40  ;;  %v386_v40 = vsel %vm278_vm2, %v385_v41, %v381_v55 }
  0xb1   :  { %v405_v1 = vrot.slane %v216_v33, %v1425_v30  ;;  %v391_v13 = vsel %vm285_vm3, %v390_v11, %v386_v40 }
  0xb2   :  { %v1393_v43 = vpop.xlane.xlu1 %166  ;;  %v305_v51 = vrot.slane %v200_v28, %v1425_v30  ;;  %v396_v23 = vsel %vm292_vm4, %v395_v35, %v391_v13 }
  0xb3   :  { %v1395_v42 = vpop.xlane.xlu0 %118  ;;  %v217_v34 = vmul.f32 0.00390625, %v1393_v43  ;;  %v279_v43 = vsel %vm278_vm2, %v277_v32, %v272_v48  ;;  %v401_v5 = vsel %vm299_vm5, %v400_v61, %v396_v23  ;;  %vm457_vm2 = vcmask 1041409  }
  0xb4   :  { %v201_v29 = vmul.f32 0.00390625, %v1395_v42  ;;  %v286_v52 = vsel %vm285_vm3, %v284_v54, %v279_v43  ;;  %v406_v10 = vsel %vm306_vm6, %v405_v1, %v401_v5 }
  0xb5   :  { %v410_v33 = vrot.slane %v217_v34, %v1428_v37  ;;  %v293_v32 = vsel %vm292_vm4, %v291_v56, %v286_v52 }
  0xb6   :  { %v1397_v58 = vpop.xlane.xlu1 %169  ;;  %v312_v30 = vrot.slane %v201_v29, %v1428_v37  ;;  %v300_v47 = vsel %vm299_vm5, %v298_v62, %v293_v32 }
  0xb7   :  { %v1399_v59 = vpop.xlane.xlu0 %121  ;;  %v218_v50 = vmul.f32 0.00390625, %v1397_v58 }
  0xb8   :  { %v202_v49 = vmul.f32 0.00390625, %v1399_v59  ;;  %v307_v59 = vsel %vm306_vm6, %v305_v51, %v300_v47 }
  0xb9   :  { %v415_v53 = vrot.slane %v218_v50, %v1431_v16 }
  0xba   :  { %v1403_v36 = vpop.xlane.xlu1 %172  ;;  %v319_v55 = vrot.slane %v202_v49, %v1431_v16 }
  0xbb   :  { %v1405_v25 = vpop.xlane.xlu0 %124  ;;  %v219_v58 = vmul.f32 0.00390625, %v1403_v36  ;;  %v411_v36 = vsel %vm313_vm7, %v410_v33, %v406_v10 }
  0xbc   :  { %v203_v41 = vmul.f32 0.00390625, %v1405_v25  ;;  %v416_v40 = vsel %vm320_vm8, %v415_v53, %v411_v36 }
  0xbd   :  { %v420_v25 = vrot.slane %v219_v58, %v1434_v19 }
  0xbe   :  { %v1414_v0 = vpop.xlane.xlu1 %175  ;;  %v326_v61 = vrot.slane %v203_v41, %v1434_v19 }
  0xbf   :  { %v1422_v22 = vpop.xlane.xlu0 %127  ;;  %v220_v7 = vmul.f32 0.00390625, %v1414_v0  ;;  %v314_v0 = vsel %vm313_vm7, %v312_v30, %v307_v59  ;;  %v421_v51 = vsel %vm327_vm9, %v420_v25, %v416_v40 }
  0xc0   :  { %v204_v11 = vmul.f32 0.00390625, %v1422_v22  ;;  %v321_v1 = vsel %vm320_vm8, %v319_v55, %v314_v0  ;;  %v961_v0 = vld [vmem:[%s1609_s2] ss:$0 sm:$0xff]  ;;  %s1099_s2 = smov [#allocation5]  }
  0xc1   :  { %v425_v22 = vrot.slane %v220_v7, %v1437_v18 }
  0xc2   :  { %v179_v6 = vpop.xlane.xlu1 %178  ;;  %v333_v16 = vrot.slane %v204_v11, %v1437_v18  ;;  %v328_v18 = vsel %vm327_vm9, %v326_v61, %v321_v1  ;;  %v962_v61 = vld [vmem:[%s1611_s4] ss:$0 sm:$0xff] }
  0xc3   :  { %v131_v44 = vpop.xlane.xlu0 %130  ;;  %v221_v28 = vmul.f32 0.00390625, %v179_v6  ;;  %v426_v23 = vsel %vm334_vm10, %v425_v22, %v421_v51 }
  0xc4   :  { %v205_v54 = vmul.f32 0.00390625, %v131_v44 }
  0xc5   :  { %v430_v44 = vrot.slane %v221_v28, %v1440_v57 }
  0xc6   :  { %v182_v3 = vpop.xlane.xlu1 %181  ;;  %v340_v43 = vrot.slane %v205_v54, %v1440_v57  ;;  %v335_v57 = vsel %vm334_vm10, %v333_v16, %v328_v18 }
  0xc7   :  { %v134_v60 = vpop.xlane.xlu0 %133  ;;  %v222_v35 = vmul.f32 0.00390625, %v182_v3 }
  0xc8   :  { %v206_v48 = vmul.f32 0.00390625, %v134_v60  ;;  %v342_v30 = vsel %vm341_vm11, %v340_v43, %v335_v57  ;;  %v751_v43 = vsub.s32 1, %v1401_v31 }
  0xc9   :  { %v435_v60 = vrot.slane %v222_v35, %v1443_v63 }
  0xca   :  { %v185_v42 = vpop.xlane.xlu1 %184  ;;  %v347_v50 = vrot.slane %v206_v48, %v1443_v63 }
  0xcb   :  { %v137_v24 = vpop.xlane.xlu0 %136  ;;  %v223_v56 = vmul.f32 0.00390625, %v185_v42 }
  0xcc   :  { %v207_v6 = vmul.f32 0.00390625, %v137_v24  ;;  %v431_v24 = vsel %vm341_vm11, %v430_v44, %v426_v23 }
  0xcd   :  { %v440_v42 = vrot.slane %v223_v56, %v1446_v12  ;;  %v436_v58 = vsel %vm348_vm12, %v435_v60, %v431_v24 }
  0xce   :  { %v188_v37 = vpop.xlane.xlu1 %187  ;;  %v354_v33 = vrot.slane %v207_v6, %v1446_v12  ;;  %v349_v12 = vsel %vm348_vm12, %v347_v50, %v342_v30  ;;  %v1719_v30 = vld [vmem:[#allocation30_spill] sm:$0xff] }
  0xcf   :  { %v140_v34 = vpop.xlane.xlu0 %139  ;;  %v224_v29 = vmul.f32 0.00390625, %v188_v37  ;;  %v441_v7 = vsel %vm355_vm13, %v440_v42, %v436_v58 }
  0xd0   :  { %v208_v3 = vmul.f32 0.00390625, %v140_v34  ;;  %v356_v53 = vsel %vm355_vm13, %v354_v33, %v349_v12  ;;  %v531_v34 = vld [vmem:[%s1610_s3] sm:$0xff]  ;;  %s949_s3 = sshll.u32 %s1099_s2, 4  ;;  %s950_s3 = int_to_ptr.vmem [resolvable:$true] %s949_s3 }
  0xd1   :  { %v445_v49 = vrot.slane %v224_v29, %v1449_v46  ;;  %1036 = vmatpush3.xpose.msk.msra.mxu1 %vm554_vm1, %v531_v34  ;;  %v1728_v34 = vld [vmem:[#allocation47_spill] sm:$0xff]  ;;  %s1070_s4 = scalar_lea.vmem %s950_s3, 8192  ;;  %p1075_p6 = scmp.lt.s32.totalorder %s950_s3, %s950_s3 }
  0xd2   :  { %v191_v62 = vpop.xlane.xlu1 %190  ;;  %v361_v32 = vrot.slane %v208_v3, %v1449_v46  ;;  %v684_v3 = vsub.s32 0, %v1401_v31  ;;  %p1071_p5 = scmp.ne.s32.totalorder %s950_s3, %s1070_s4  ;;  %p1076_p7 = scmp.lt.s32.totalorder %s1070_s4, %s1070_s4 }
  0xd3   :  { %v225_v13 = vmul.f32 0.00390625, %v191_v62  ;;  %v143_v19 = vpop.xlane.xlu0 %142  ;;  %v446_v46 = vsel %vm362_vm14, %v445_v49, %v441_v7  ;;  %v1723_v7 = vld [vmem:[#allocation38_spill] sm:$0xff] }
  0xd4   :  { %v209_v52 = vmul.f32 0.00390625, %v143_v19  ;;  %v363_v28 = vsel %vm362_vm14, %v361_v32, %v356_v53  ;;  %v1724_v53 = vld [vmem:[#allocation39_spill] sm:$0xff]  ;;  %p1077_p8 = por %p1076_p7, %p1075_p6 }
  0xd5   :  { %v450_v5 = vrot.slane %v225_v13, %v1454_v17 }
  0xd6   :  { %v194_v63 = vpop.xlane.xlu1 %193  ;;  %v368_v47 = vrot.slane %v209_v52, %v1454_v17  ;;  %p1078_p9 = pnand %p1077_p8, %p1071_p5 }
  0xd7   :  { %v226_v10 = vmul.f32 0.00390625, %v194_v63  ;;  %v146_v41 = vpop.xlane.xlu0 %145  ;;  %v451_v17 = vsel %vm369_vm15, %v450_v5, %v446_v46  ;;  %v1718_v5 = vld [vmem:[#allocation21_spill] sm:$0xff] }
  0xd8   :  { %v210_v59 = vmul.f32 0.00390625, %v146_v41  ;;  %v370_v36 = vsel %vm369_vm15, %v368_v47, %v363_v28  ;;  %v1720_v47 = vld [vmem:[#allocation31_spill] sm:$0xff] }
  0xd9   :  { %v455_v11 = vrot.slane %v226_v10, %v1468_v45  ;;  %v1722_v41 = vld [vmem:[#allocation27_spill] sm:$0xff] }
  0xda   :  { %v375_v37 = vrot.slane %v210_v59, %v1468_v45 }
  0xdb   :  { %v456_v55 = vsel %vm376_vm0, %v455_v11, %v451_v17 }
  0xdc   :  { %v377_v54 = vsel %vm376_vm0, %v375_v37, %v370_v36  ;;  %v1725_v37 = vld [vmem:[#allocation34_spill] sm:$0xff]  ;;  %v1726_v36 = vld [vmem:[#allocation35_spill] sm:$0xff] }
  0xdd   :  { %v458_v35 = vsel %vm457_vm2, %v456_v55, %v377_v54  ;;  %v1727_v54 = vld [vmem:[#allocation46_spill] sm:$0xff] }
  0xde   :  { %1003 = vmatmul.mubr.f32.vlgmr.msra.gmra.mxu0 %v458_v35 }
 0x19e   :  { %v526_v45 = vpop.f32.mrf.mxu0 }
 0x19f   :  { %v527_v25 = vadd.f32 %v961_v0, %v526_v45 }
 0x1a0   :  { %v1004_v48 = vpop.f32.mrf.mxu0 }
 0x1a1   :  { %v530_v56 = vmax.f32 %v527_v25, 0.0  ;;  %v1729_v48 = vld [vmem:[#allocation42_spill] sm:$0xff] }
 0x1a3   :  { %1038 = vmatmul.mubr.msk.f32.vlgmr.msra.gmra.mxu1 %vm554_vm1, %v530_v56 }
 0x263   :  { %v672_v22 = vpop.f32.mrf.mxu1 }
 0x264   :  { %v673_v6 = vadd.f32 %v962_v61, %v672_v22  ;;  %v1730_v61 = vld [vmem:[#allocation43_spill] sm:$0xff] }
 0x265   :  { %v1039_v29 = vpop.f32.mrf.mxu1 }
 0x266   :  { %v980_v40 = vmul.f32 -1.442695, %v673_v6  ;;  %v1731_v6 = vld [vmem:[#allocation54_spill] sm:$0xff] }
 0x268   :  { %1046 = vpow2.f32 %v980_v40  ;;  %v1732_v40 = vld [vmem:[#allocation55_spill] sm:$0xff] }
 0x275   :  { %v1047_v16 = vpop.eup %1046 }
 0x276   :  { %v679_v44 = vadd.f32 1.0, %v1047_v16 }
 0x278   :  { %1048 = vrcp.f32 %v679_v44 }
 0x285   :  { %v1049_v62 = vpop.eup %1048 }
 0x286   :  { %v685_v1 = vrot.slane %v1049_v62, %v684_v3  ;;  %v752_v60 = vrot.slane %v1049_v62, %v751_v43  ;;  %v1733_v62 = vld [vmem:[#allocation50_spill] sm:$0xff]  ;;  %v1734_v43 = vld [vmem:[#allocation51_spill] sm:$0xff] }
 0x288   :  { %691 = vbcast.lane.b32.xlu1 %v685_v1, 264  ;;  %687 = vbcast.lane.b32.xlu0 %v685_v1, 256 }
 0x28c   :  { %695 = vbcast.lane.b32.xlu1 %v685_v1, 272  ;;  %703 = vbcast.lane.b32.xlu0 %v685_v1, 288 }
 0x290   :  { %699 = vbcast.lane.b32.xlu1 %v685_v1, 280  ;;  %711 = vbcast.lane.b32.xlu0 %v685_v1, 304 }
 0x294   :  { %707 = vbcast.lane.b32.xlu1 %v685_v1, 296  ;;  %719 = vbcast.lane.b32.xlu0 %v685_v1, 320 }
 0x298   :  { %715 = vbcast.lane.b32.xlu1 %v685_v1, 312  ;;  %727 = vbcast.lane.b32.xlu0 %v685_v1, 336 }
 0x29c   :  { %723 = vbcast.lane.b32.xlu1 %v685_v1, 328  ;;  %735 = vbcast.lane.b32.xlu0 %v685_v1, 352 }
 0x2a0   :  { %731 = vbcast.lane.b32.xlu1 %v685_v1, 344  ;;  %743 = vbcast.lane.b32.xlu0 %v685_v1, 368 }
 0x2a4   :  { %739 = vbcast.lane.b32.xlu1 %v685_v1, 360  ;;  %754 = vbcast.lane.b32.xlu0 %v752_v60, 256 }
 0x2a8   :  { %747 = vbcast.lane.b32.xlu1 %v685_v1, 376  ;;  %762 = vbcast.lane.b32.xlu0 %v752_v60, 272 }
 0x2ac   :  { %758 = vbcast.lane.b32.xlu1 %v752_v60, 264  ;;  %770 = vbcast.lane.b32.xlu0 %v752_v60, 288 }
 0x2b0   :  { %766 = vbcast.lane.b32.xlu1 %v752_v60, 280  ;;  %778 = vbcast.lane.b32.xlu0 %v752_v60, 304 }
 0x2b4   :  { %774 = vbcast.lane.b32.xlu1 %v752_v60, 296  ;;  %786 = vbcast.lane.b32.xlu0 %v752_v60, 320 }
 0x2b8   :  { %782 = vbcast.lane.b32.xlu1 %v752_v60, 312  ;;  %794 = vbcast.lane.b32.xlu0 %v752_v60, 336 }
 0x2bc   :  { %790 = vbcast.lane.b32.xlu1 %v752_v60, 328  ;;  %802 = vbcast.lane.b32.xlu0 %v752_v60, 352 }
 0x2c0   :  { %798 = vbcast.lane.b32.xlu1 %v752_v60, 344  ;;  %810 = vbcast.lane.b32.xlu0 %v752_v60, 368 }
 0x2c4   :  { %806 = vbcast.lane.b32.xlu1 %v752_v60, 360 }
 0x2c8   :  { %814 = vbcast.lane.b32.xlu1 %v752_v60, 376 }
 0x2fa   :  { %v692_v31 = vpop.permute.xlu1 %691  ;;  %v688_v13 = vpop.permute.xlu0 %687 }
 0x2fb   :  { %v818_v19 = vmul.f32 %v692_v31, %v1152_v8  ;;  %v819_v51 = vmul.f32 %v692_v31, %v1154_v9  ;;  %v816_v50 = vmul.f32 %v688_v13, %v1140_v2  ;;  %v817_v42 = vmul.f32 %v688_v13, %v1144_v4  ;;  %v1735_v31 = vld [vmem:[#allocation8_spill] sm:$0xff] }
 0x2fd   :  { %882 = vst [vmem:[#allocation5 + $0x10] sm:$0xff] %v818_v19  ;;  %883 = vst [vmem:[#allocation5 + $0x18] sm:$0xff] %v819_v51  ;;  %v1736_v19 = vld [vmem:[#allocation9_spill] sm:$0xff] }
 0x2fe   :  { %880 = vst [vmem:[#allocation5] sm:$0xff] %v816_v50  ;;  %881 = vst [vmem:[#allocation5 + $0x8] sm:$0xff] %v817_v42  ;;  %v696_v52 = vpop.permute.xlu1 %695  ;;  %v704_v18 = vpop.permute.xlu0 %703 }
 0x2ff   :  { %v820_v23 = vmul.f32 %v696_v52, %v1164_v14  ;;  %v821_v33 = vmul.f32 %v696_v52, %v1166_v15  ;;  %v824_v49 = vmul.f32 %v704_v18, %v1188_v26  ;;  %v825_v8 = vmul.f32 %v704_v18, %v1190_v27  ;;  %v1717_v27 = vld [vmem:[#allocation20_spill] sm:$0xff]  ;;  %v1737_v52 = vld [vmem:[#allocation58_spill] sm:$0xff] }
 0x301   :  { %884 = vst [vmem:[#allocation5 + $0x20] sm:$0xff] %v820_v23  ;;  %885 = vst [vmem:[#allocation5 + $0x28] sm:$0xff] %v821_v33  ;;  %v1738_v23 = vld [vmem:[#allocation59_spill] sm:$0xff] }
 0x302   :  { %888 = vst [vmem:[#allocation5 + $0x40] sm:$0xff] %v824_v49  ;;  %889 = vst [vmem:[#allocation5 + $0x48] sm:$0xff] %v825_v8  ;;  %v700_v2 = vpop.permute.xlu1 %699  ;;  %v712_v4 = vpop.permute.xlu0 %711  ;;  %v1739_v49 = vld [vmem:[#allocation12_spill] sm:$0xff] }
 0x303   :  { %v822_v9 = vmul.f32 %v700_v2, %v1176_v20  ;;  %v823_v57 = vmul.f32 %v700_v2, %v1178_v21  ;;  %v828_v24 = vmul.f32 %v712_v4, %v1212_v38  ;;  %v829_v14 = vmul.f32 %v712_v4, %v1214_v39  ;;  %v1721_v39 = vld [vmem:[#allocation26_spill] sm:$0xff]  ;;  %v1740_v2 = vld [vmem:[#allocation13_spill] sm:$0xff] }
 0x305   :  { %886 = vst [vmem:[#allocation5 + $0x30] sm:$0xff] %v822_v9  ;;  %887 = vst [vmem:[#allocation5 + $0x38] sm:$0xff] %v823_v57 }
 0x306   :  { %892 = vst [vmem:[#allocation5 + $0x60] sm:$0xff] %v828_v24  ;;  %893 = vst [vmem:[#allocation5 + $0x68] sm:$0xff] %v829_v14  ;;  %v708_v15 = vpop.permute.xlu1 %707  ;;  %v720_v26 = vpop.permute.xlu0 %719  ;;  %v1741_v24 = vld [vmem:[#allocation10_spill] sm:$0xff] }
 0x307   :  { %v826_v32 = vmul.f32 %v708_v15, %v1717_v27  ;;  %v827_v63 = vmul.f32 %v708_v15, %v1718_v5  ;;  %v832_v58 = vmul.f32 %v720_v26, %v1719_v30  ;;  %v833_v20 = vmul.f32 %v720_v26, %v1720_v47  ;;  %v1742_v15 = vld [vmem:[#allocation11_spill] sm:$0xff]  ;;  %v1743_v27 = vld [vmem:[#allocation16_spill] sm:$0xff]  ;;  %v1744_v5 = vld [vmem:[#allocation17_spill] sm:$0xff] }
 0x308   :  { %v1745_v47 = vld [vmem:[#allocation14_spill] sm:$0xff] }
 0x309   :  { %890 = vst [vmem:[#allocation5 + $0x50] sm:$0xff] %v826_v32  ;;  %891 = vst [vmem:[#allocation5 + $0x58] sm:$0xff] %v827_v63 }
 0x30a   :  { %896 = vst [vmem:[#allocation5 + $0x80] sm:$0xff] %v832_v58  ;;  %897 = vst [vmem:[#allocation5 + $0x88] sm:$0xff] %v833_v20  ;;  %v716_v21 = vpop.permute.xlu1 %715  ;;  %v728_v38 = vpop.permute.xlu0 %727 }
 0x30b   :  { %v830_v10 = vmul.f32 %v716_v21, %v1721_v39  ;;  %v831_v12 = vmul.f32 %v716_v21, %v1722_v41  ;;  %v836_v59 = vmul.f32 %v728_v38, %v1723_v7  ;;  %v837_v46 = vmul.f32 %v728_v38, %v1724_v53  ;;  %v1746_v21 = vld [vmem:[#allocation15_spill] sm:$0xff]  ;;  %v1747_v39 = vld [vmem:[#allocation22_spill] sm:$0xff] }
 0x30c   :  { %v1748_v41 = vld [vmem:[#allocation23_spill] sm:$0xff]  ;;  %v1749_v53 = vld [vmem:[#allocation18_spill] sm:$0xff] }
 0x30d   :  { %894 = vst [vmem:[#allocation5 + $0x70] sm:$0xff] %v830_v10  ;;  %895 = vst [vmem:[#allocation5 + $0x78] sm:$0xff] %v831_v12 }
 0x30e   :  { %900 = vst [vmem:[#allocation5 + $0xa0] sm:$0xff] %v836_v59  ;;  %901 = vst [vmem:[#allocation5 + $0xa8] sm:$0xff] %v837_v46  ;;  %v724_v11 = vpop.permute.xlu1 %723  ;;  %v736_v28 = vpop.permute.xlu0 %735 }
 0x30f   :  { %v834_v17 = vmul.f32 %v724_v11, %v1725_v37  ;;  %v835_v55 = vmul.f32 %v724_v11, %v1726_v36  ;;  %v840_v35 = vmul.f32 %v736_v28, %v1727_v54  ;;  %v841_v0 = vmul.f32 %v736_v28, %v1728_v34  ;;  %v1750_v11 = vld [vmem:[#allocation19_spill] sm:$0xff]  ;;  %v1751_v37 = vld [vmem:[#allocation28_spill] sm:$0xff]  ;;  %v1752_v36 = vld [vmem:[#allocation29_spill] sm:$0xff] }
 0x310   :  { %v1753_v34 = vld [vmem:[#allocation24_spill] sm:$0xff] }
 0x311   :  { %898 = vst [vmem:[#allocation5 + $0x90] sm:$0xff] %v834_v17  ;;  %899 = vst [vmem:[#allocation5 + $0x98] sm:$0xff] %v835_v55 }
 0x312   :  { %904 = vst [vmem:[#allocation5 + $0xc0] sm:$0xff] %v840_v35  ;;  %905 = vst [vmem:[#allocation5 + $0xc8] sm:$0xff] %v841_v0  ;;  %v732_v45 = vpop.permute.xlu1 %731  ;;  %v744_v25 = vpop.permute.xlu0 %743 }
 0x313   :  { %v838_v56 = vmul.f32 %v732_v45, %v1729_v48  ;;  %v839_v22 = vmul.f32 %v732_v45, %v1730_v61  ;;  %v844_v29 = vmul.f32 %v744_v25, %v1731_v6  ;;  %v845_v16 = vmul.f32 %v744_v25, %v1732_v40  ;;  %v1754_v45 = vld [vmem:[#allocation25_spill] sm:$0xff]  ;;  %v1755_v48 = vld [vmem:[#allocation36_spill] sm:$0xff] }
 0x314   :  { %v1756_v61 = vld [vmem:[#allocation37_spill] sm:$0xff]  ;;  %v1757_v40 = vld [vmem:[#allocation32_spill] sm:$0xff] }
 0x315   :  { %902 = vst [vmem:[#allocation5 + $0xb0] sm:$0xff] %v838_v56  ;;  %903 = vst [vmem:[#allocation5 + $0xb8] sm:$0xff] %v839_v22 }
 0x316   :  { %908 = vst [vmem:[#allocation5 + $0xe0] sm:$0xff] %v844_v29  ;;  %909 = vst [vmem:[#allocation5 + $0xe8] sm:$0xff] %v845_v16  ;;  %v740_v44 = vpop.permute.xlu1 %739  ;;  %v755_v3 = vpop.permute.xlu0 %754 }
 0x317   :  { %v842_v1 = vmul.f32 %v740_v44, %v1733_v62  ;;  %v843_v60 = vmul.f32 %v740_v44, %v1734_v43  ;;  %v848_v13 = vmul.f32 %v755_v3, %v1735_v31  ;;  %v849_v51 = vmul.f32 %v755_v3, %v1736_v19  ;;  %v1758_v44 = vld [vmem:[#allocation33_spill] sm:$0xff]  ;;  %v1759_v62 = vld [vmem:[#allocation44_spill] sm:$0xff] }
 0x318   :  { %v1760_v43 = vld [vmem:[#allocation45_spill] sm:$0xff]  ;;  %v1761_v19 = vld [vmem:[#allocation40_spill] sm:$0xff] }
 0x319   :  { %906 = vst [vmem:[#allocation5 + $0xd0] sm:$0xff] %v842_v1  ;;  %907 = vst [vmem:[#allocation5 + $0xd8] sm:$0xff] %v843_v60 }
 0x31a   :  { %912 = vst [vmem:[#allocation5 + $0x100] sm:$0xff] %v848_v13  ;;  %913 = vst [vmem:[#allocation5 + $0x108] sm:$0xff] %v849_v51  ;;  %v748_v50 = vpop.permute.xlu1 %747  ;;  %v763_v42 = vpop.permute.xlu0 %762 }
 0x31b   :  { %v846_v18 = vmul.f32 %v748_v50, %v1737_v52  ;;  %v847_v33 = vmul.f32 %v748_v50, %v1738_v23  ;;  %v852_v8 = vmul.f32 %v763_v42, %v1739_v49  ;;  %v853_v4 = vmul.f32 %v763_v42, %v1740_v2  ;;  %v1762_v50 = vld [vmem:[#allocation41_spill] sm:$0xff]  ;;  %v1763_v52 = vld [vmem:[#allocation52_spill] sm:$0xff] }
 0x31c   :  { %v1764_v23 = vld [vmem:[#allocation53_spill] sm:$0xff] }
 0x31d   :  { %910 = vst [vmem:[#allocation5 + $0xf0] sm:$0xff] %v846_v18  ;;  %911 = vst [vmem:[#allocation5 + $0xf8] sm:$0xff] %v847_v33 }
 0x31e   :  { %916 = vst [vmem:[#allocation5 + $0x120] sm:$0xff] %v852_v8  ;;  %917 = vst [vmem:[#allocation5 + $0x128] sm:$0xff] %v853_v4  ;;  %v759_v9 = vpop.permute.xlu1 %758  ;;  %v771_v57 = vpop.permute.xlu0 %770  ;;  %v1765_v8 = vld [vmem:[#allocation48_spill] sm:$0xff]  ;;  %v1766_v4 = vld [vmem:[#allocation49_spill] sm:$0xff] }
 0x31f   :  { %v850_v14 = vmul.f32 %v759_v9, %v1741_v24  ;;  %v851_v26 = vmul.f32 %v759_v9, %v1742_v15  ;;  %v856_v32 = vmul.f32 %v771_v57, %v1743_v27  ;;  %v857_v63 = vmul.f32 %v771_v57, %v1744_v5  ;;  %v1767_v24 = vld [vmem:[#allocation56_spill] sm:$0xff]  ;;  %v1768_v15 = vld [vmem:[#allocation57_spill] sm:$0xff] }
 0x321   :  { %914 = vst [vmem:[#allocation5 + $0x110] sm:$0xff] %v850_v14  ;;  %915 = vst [vmem:[#allocation5 + $0x118] sm:$0xff] %v851_v26 }
 0x322   :  { %920 = vst [vmem:[#allocation5 + $0x140] sm:$0xff] %v856_v32  ;;  %921 = vst [vmem:[#allocation5 + $0x148] sm:$0xff] %v857_v63  ;;  %v767_v30 = vpop.permute.xlu1 %766  ;;  %v779_v58 = vpop.permute.xlu0 %778 }
 0x323   :  { %v854_v20 = vmul.f32 %v767_v30, %v1745_v47  ;;  %v855_v38 = vmul.f32 %v767_v30, %v1746_v21  ;;  %v860_v10 = vmul.f32 %v779_v58, %v1747_v39  ;;  %v861_v12 = vmul.f32 %v779_v58, %v1748_v41 }
 0x325   :  { %918 = vst [vmem:[#allocation5 + $0x130] sm:$0xff] %v854_v20  ;;  %919 = vst [vmem:[#allocation5 + $0x138] sm:$0xff] %v855_v38 }
 0x326   :  { %924 = vst [vmem:[#allocation5 + $0x160] sm:$0xff] %v860_v10  ;;  %925 = vst [vmem:[#allocation5 + $0x168] sm:$0xff] %v861_v12  ;;  %v775_v7 = vpop.permute.xlu1 %774  ;;  %v787_v59 = vpop.permute.xlu0 %786 }
 0x327   :  { %v858_v46 = vmul.f32 %v775_v7, %v1749_v53  ;;  %v859_v28 = vmul.f32 %v775_v7, %v1750_v11  ;;  %v864_v17 = vmul.f32 %v787_v59, %v1751_v37  ;;  %v865_v55 = vmul.f32 %v787_v59, %v1752_v36 }
 0x329   :  { %922 = vst [vmem:[#allocation5 + $0x150] sm:$0xff] %v858_v46  ;;  %923 = vst [vmem:[#allocation5 + $0x158] sm:$0xff] %v859_v28 }
 0x32a   :  { %928 = vst [vmem:[#allocation5 + $0x180] sm:$0xff] %v864_v17  ;;  %929 = vst [vmem:[#allocation5 + $0x188] sm:$0xff] %v865_v55  ;;  %v783_v54 = vpop.permute.xlu1 %782  ;;  %v795_v35 = vpop.permute.xlu0 %794 }
 0x32b   :  { %v862_v0 = vmul.f32 %v783_v54, %v1753_v34  ;;  %v863_v25 = vmul.f32 %v783_v54, %v1754_v45  ;;  %v868_v56 = vmul.f32 %v795_v35, %v1755_v48  ;;  %v869_v22 = vmul.f32 %v795_v35, %v1756_v61 }
 0x32d   :  { %926 = vst [vmem:[#allocation5 + $0x170] sm:$0xff] %v862_v0  ;;  %927 = vst [vmem:[#allocation5 + $0x178] sm:$0xff] %v863_v25 }
 0x32e   :  { %932 = vst [vmem:[#allocation5 + $0x1a0] sm:$0xff] %v868_v56  ;;  %933 = vst [vmem:[#allocation5 + $0x1a8] sm:$0xff] %v869_v22  ;;  %v791_v6 = vpop.permute.xlu1 %790  ;;  %v803_v29 = vpop.permute.xlu0 %802 }
 0x32f   :  { %v866_v16 = vmul.f32 %v791_v6, %v1757_v40  ;;  %v867_v3 = vmul.f32 %v791_v6, %v1758_v44  ;;  %v872_v1 = vmul.f32 %v803_v29, %v1759_v62  ;;  %v873_v60 = vmul.f32 %v803_v29, %v1760_v43 }
 0x331   :  { %930 = vst [vmem:[#allocation5 + $0x190] sm:$0xff] %v866_v16  ;;  %931 = vst [vmem:[#allocation5 + $0x198] sm:$0xff] %v867_v3 }
 0x332   :  { %936 = vst [vmem:[#allocation5 + $0x1c0] sm:$0xff] %v872_v1  ;;  %937 = vst [vmem:[#allocation5 + $0x1c8] sm:$0xff] %v873_v60  ;;  %v799_v31 = vpop.permute.xlu1 %798  ;;  %v811_v13 = vpop.permute.xlu0 %810 }
 0x333   :  { %v870_v51 = vmul.f32 %v799_v31, %v1761_v19  ;;  %v871_v42 = vmul.f32 %v799_v31, %v1762_v50  ;;  %v876_v18 = vmul.f32 %v811_v13, %v1763_v52  ;;  %v877_v33 = vmul.f32 %v811_v13, %v1764_v23 }
 0x335   :  { %934 = vst [vmem:[#allocation5 + $0x1b0] sm:$0xff] %v870_v51  ;;  %935 = vst [vmem:[#allocation5 + $0x1b8] sm:$0xff] %v871_v42 }
 0x336   :  { %940 = vst [vmem:[#allocation5 + $0x1e0] sm:$0xff] %v876_v18  ;;  %941 = vst [vmem:[#allocation5 + $0x1e8] sm:$0xff] %v877_v33  ;;  %v807_v49 = vpop.permute.xlu1 %806 }
 0x337   :  { %v874_v2 = vmul.f32 %v807_v49, %v1765_v8  ;;  %v875_v9 = vmul.f32 %v807_v49, %v1766_v4 }
 0x339   :  { %938 = vst [vmem:[#allocation5 + $0x1d0] sm:$0xff] %v874_v2  ;;  %939 = vst [vmem:[#allocation5 + $0x1d8] sm:$0xff] %v875_v9 }
 0x33a   :  { %v815_v57 = vpop.permute.xlu1 %814 }
 0x33b   :  { %v878_v14 = vmul.f32 %v815_v57, %v1767_v24  ;;  %v879_v26 = vmul.f32 %v815_v57, %v1768_v15 }
 0x33d   :  { %942 = vst [vmem:[#allocation5 + $0x1f0] sm:$0xff] %v878_v14  ;;  %943 = vst [vmem:[#allocation5 + $0x1f8] sm:$0xff] %v879_v26 }
 0x33e   :  { %1081 = shalt.err (!%p1078_p9)
}
 0x33f   :  { %955 = dma.vmem_to_hbm [thread:$0]  %s950_s3, 8192, %s1612_s5, [#allocation4], %s1095_s21, %s1095_s21, %s1096_s22  }
 0x340   :  { %1092 = dma.done.wait [#allocation4], 8192  }
 0x341   :  { %1093 = vsyncadd [#allocation4], 4294959104 }
 0x342   :  { %959 = vsyncpa [#allocation3], 1 }
 0x343   :  { %960 = vsyncpa [#allocation4], 1 }

</bundles_post_ra>
